<compile_context>
chip_gen: v6e
topology: v6e:2x2x1
jax: 0.10.0
libtpu: 0.0.40
codegen_flags: <defaults>
</compile_context>

<pallas_src>
import functools
import math

import jax
import jax.numpy as jnp
from jax.experimental import pallas as pl
from jax.experimental.pallas import tpu as pltpu


def _rbf_kernel(x_ref, w_ref, b_ref, o_ref, *, scale, unroll_dot):
    """o = scale * cos(x @ W' + b'); standardization pre-folded into W', b'."""
    x = x_ref[...]
    w = w_ref[...]
    if unroll_dot:
        # Tiny contraction (D <= 8) on a narrow tile: D broadcast multiply-adds
        # on the VPU beat an MXU push/pop that would use ~3% of the array.
        z = x[:, 0:1] * w[0:1, :]
        for d in range(1, x.shape[1]):
            z = z + x[:, d:d + 1] * w[d:d + 1, :]
    else:
        # Large tiles: run the K=D contraction on the MXU so VALU/XLU slots
        # stay free for the cos epilogue (the real per-lane work).
        z = jnp.dot(x, w, preferred_element_type=jnp.float32)
    # Bias + cosine + amplitude in f32 (v5e VPU/EUP have no bf16 path); only
    # the final store narrows to o_ref.dtype (bf16 output halves HBM writeback).
    o_ref[...] = (scale * jnp.cos(z + b_ref[...])).astype(o_ref.dtype)


def _round_up(x, m):
    return ((x + m - 1) // m) * m


def rbf_transform(states, w_folded, b_folded, scale, *,
                  batch_tile=1024, feature_tile=2048,
                  out_dtype=jnp.float32, gridless_max_rows=128):
    """states: [B, D] -> [B, F] with F = n_gammas * components.

    w_folded: [D, F] standardization-folded random-feature weights.
    b_folded: [F]    standardization-folded biases.
    """
    B, D = states.shape
    F = w_folded.shape[1]

    x = states.astype(jnp.float32)
    w2 = w_folded.astype(jnp.float32)
    b2 = b_folded.reshape(1, F).astype(jnp.float32)
    out_itemsize = jnp.dtype(out_dtype).itemsize

    # ---- small-batch gridless path (single invocation, no pipeline) -------
    gridless_bytes = (B * D + D * F + F) * 4 + B * F * out_itemsize
    if B <= gridless_max_rows and gridless_bytes <= 24 * 1024 * 1024:
        # TODO(synk): for per-step RL batches (B ~ 8-128) a plain jnp
        # scale*cos(x@W'+b') inside the caller's jit avoids the Mosaic launch
        # overhead entirely; kept as a Pallas call here so the kernel path is
        # exercised.  Batch many env steps before calling when possible.
        kernel = functools.partial(_rbf_kernel, scale=scale,
                                   unroll_dot=(D <= 8))
        return pl.pallas_call(
            kernel,
            out_shape=jax.ShapeDtypeStruct((B, F), out_dtype),
        )(x, w2, b2)

    # ---- large-batch tiled path -------------------------------------------
    # Batch tile: >= 2 grid steps, count kept even-ish so v7x's two
    # TensorCores split the work evenly; 8-aligned for sublane alignment.
    n_b = pl.cdiv(B, batch_tile)
    n_b = max(2, n_b + (n_b % 2))              # even, at least 2
    TB = min(_round_up(batch_tile, 8), _round_up(pl.cdiv(B, n_b), 8))
    grid_b = pl.cdiv(B, TB)

    # Feature tile: full F when small, else a lane-dense multiple of 128.
    if F <= feature_tile or F % 128 != 0:
        TF = F
    else:
        TF = max(128, (min(feature_tile, F) // 128) * 128)
    grid_f = pl.cdiv(F, TF)

    unroll_dot = (D <= 8) and (TB < 512)

    # Re-derive scoped VMEM from the actual double-buffered tile footprint;
    # v7x's physical ceiling is 64 MiB (not 128).
    tile_bytes = 2 * (TB * D * 4 + D * TF * 4 + TF * 4 + TB * TF * out_itemsize)
    vmem_limit = min(max(tile_bytes + (2 << 20), 32 << 20), 64 << 20)

    kernel = functools.partial(_rbf_kernel, scale=scale, unroll_dot=unroll_dot)

    # No padding / no out[:B] slice: Pallas masks the partial last block's
    # writeback, so out_shape is exactly (B, F).
    return pl.pallas_call(
        kernel,
        out_shape=jax.ShapeDtypeStruct((B, F), out_dtype),
        grid=(grid_b, grid_f),
        in_specs=[
            pl.BlockSpec((TB, D), lambda i, j: (i, 0)),   # batch-tiled states
            pl.BlockSpec((D, TF), lambda i, j: (0, j)),   # folded weights
            pl.BlockSpec((1, TF), lambda i, j: (0, j)),   # folded biases
        ],
        out_specs=pl.BlockSpec((TB, TF), lambda i, j: (i, j)),
        compiler_params=pltpu.CompilerParams(
            # Both axes independent -> shard across TensorCores on v7x.
            dimension_semantics=("parallel", "parallel"),
            vmem_limit_bytes=vmem_limit,
        ),
    )(x, w2, b2)


class RBFEncoderPallas:
    """JAX/Pallas port of RBFEncoder.

    out_size() == n_gammas * components; forward returns (features, history).
    """

    def __init__(self, obs_dim, gammas, components, key):
        self.obs_dim = obs_dim
        self.gammas = list(gammas)
        self.components = components
        self.size = len(gammas) * components          # == self.encoder.size
        self.scale = math.sqrt(2.0 / components)      # pure-Python constant

        k_mean, k_std, *k_ws = jax.random.split(key, 2 + 2 * len(gammas))
        # Deterministic synthetic "fitted" scaler statistics.
        self.mean = jax.random.normal(k_mean, (obs_dim,), jnp.float32)
        self.std = 0.5 + jax.random.uniform(k_std, (obs_dim,), jnp.float32)

        ws, bs = [], []
        for i, g in enumerate(self.gammas):
            kw, kb = k_ws[2 * i], k_ws[2 * i + 1]
            # sklearn RBFSampler: W = sqrt(2*gamma) * N(0,1), b ~ U(0, 2*pi)
            ws.append(jnp.sqrt(2.0 * g)
                      * jax.random.normal(kw, (obs_dim, components), jnp.float32))
            bs.append(2.0 * jnp.pi
                      * jax.random.uniform(kb, (components,), jnp.float32))
        # Fuse per-gamma samplers into one projection (feature concat on lanes).
        self.weights = jnp.concatenate(ws, axis=1)    # [D, G*C]
        self.biases = jnp.concatenate(bs, axis=0)     # [G*C]

        # One-time fold of standardization into the projection.
        inv_std = 1.0 / self.std
        self.w_folded = inv_std[:, None] * self.weights               # [D, G*C]
        self.b_folded = self.biases - (self.mean * inv_std) @ self.weights

    def out_size(self):
        return self.size

    def forward(self, states, history, *, out_dtype=jnp.float32):
        B = states.shape[0]
        feats = rbf_transform(states.reshape(-1, self.obs_dim),
                              self.w_folded, self.b_folded, self.scale,
                              out_dtype=out_dtype)
        return feats.reshape(B, -1), history


def _reference(states, enc):
    # Unfused reference (mean/std/W/b form) to validate the folded kernel.
    scaled = (states - enc.mean[None, :]) / enc.std[None, :]
    z = scaled @ enc.weights + enc.biases[None, :]
    return jnp.sqrt(2.0 / enc.components) * jnp.cos(z)


if __name__ == "__main__":
    key = jax.random.PRNGKey(0)
    k_enc, k_x, k_h, k_big = jax.random.split(key, 4)

    obs_dim = 4                      # e.g. CartPole observation size
    gammas = [0.5, 1.0, 2.5, 5.0]
    components = 32                  # out_size = 4 * 32 = 128
    batch = 8
    n_features = 4                   # cfg['history_features']

    enc = RBFEncoderPallas(obs_dim, gammas, components, k_enc)

    # --- small batch: gridless path (matches the RL per-step use case) ---
    states = jax.random.normal(k_x, (batch, obs_dim), jnp.float32)
    history = jax.random.normal(k_h, (batch, 1, 1, n_features), jnp.float32)

    feats, hist_out = enc.forward(states, history)
    feats = jax.block_until_ready(feats)

    ref = _reference(states, enc)
    assert feats.shape == (batch, enc.out_size())
    assert hist_out.shape == history.shape
    assert jnp.allclose(feats, ref, atol=1e-4, rtol=1e-4)
    assert jnp.allclose(hist_out, history)

    # --- larger batch: exercises the 2-step "parallel" tiled path (no pad,
    #     partial last block masked on writeback) ---
    big_b = 600
    big_states = jax.random.normal(k_big, (big_b, obs_dim), jnp.float32)
    big_feats = rbf_transform(big_states, enc.w_folded, enc.b_folded, enc.scale)
    big_feats = jax.block_until_ready(big_feats)
    big_ref = _reference(big_states, enc)
    assert big_feats.shape == (big_b, enc.out_size())
    assert jnp.allclose(big_feats, big_ref, atol=1e-4, rtol=1e-4)

    # --- bf16 output option: f32 compute, narrowed only at the store ---
    bf16_feats = rbf_transform(big_states, enc.w_folded, enc.b_folded,
                               enc.scale, out_dtype=jnp.bfloat16)
    bf16_feats = jax.block_until_ready(bf16_feats)
    assert bf16_feats.dtype == jnp.bfloat16
    assert jnp.allclose(bf16_feats.astype(jnp.float32), big_ref,
                        atol=1e-2, rtol=1e-2)

    print("KERNEL_OK")
</pallas_src>

<mosaic_0001>
module attributes {stable_mosaic.version = 11 : i64} {
  func.func @_rbf_kernel(%arg0: memref<8x4xf32, #tpu.memory_space<vmem>>, %arg1: memref<4x128xf32, #tpu.memory_space<vmem>>, %arg2: memref<1x128xf32, #tpu.memory_space<vmem>>, %arg3: memref<8x128xf32, #tpu.memory_space<vmem>>) attributes {dimension_semantics = [], scalar_prefetch = 0 : i64, scratch_operands = 0 : i64, tpu.core_type = #tpu.core_type<tc>} {
    %c0 = arith.constant 0 : index
    %c0_0 = arith.constant 0 : index
    %0 = vector.load %arg0[%c0, %c0_0] : memref<8x4xf32, #tpu.memory_space<vmem>>, vector<8x4xf32>
    %c0_1 = arith.constant 0 : index
    %c0_2 = arith.constant 0 : index
    %1 = vector.load %arg1[%c0_1, %c0_2] : memref<4x128xf32, #tpu.memory_space<vmem>>, vector<4x128xf32>
    %2 = vector.extract_strided_slice %0 {offsets = [0, 0], sizes = [8, 1], strides = [1, 1]} : vector<8x4xf32> to vector<8x1xf32>
    %3 = vector.extract_strided_slice %1 {offsets = [0, 0], sizes = [1, 128], strides = [1, 1]} : vector<4x128xf32> to vector<1x128xf32>
    %4 = vector.broadcast %2 : vector<8x1xf32> to vector<8x128xf32>
    %5 = vector.broadcast %3 : vector<1x128xf32> to vector<8x128xf32>
    %6 = arith.mulf %4, %5 : vector<8x128xf32>
    %7 = vector.extract_strided_slice %0 {offsets = [0, 1], sizes = [8, 1], strides = [1, 1]} : vector<8x4xf32> to vector<8x1xf32>
    %8 = vector.extract_strided_slice %1 {offsets = [1, 0], sizes = [1, 128], strides = [1, 1]} : vector<4x128xf32> to vector<1x128xf32>
    %9 = vector.broadcast %7 : vector<8x1xf32> to vector<8x128xf32>
    %10 = vector.broadcast %8 : vector<1x128xf32> to vector<8x128xf32>
    %11 = arith.mulf %9, %10 : vector<8x128xf32>
    %12 = arith.addf %6, %11 : vector<8x128xf32>
    %13 = vector.extract_strided_slice %0 {offsets = [0, 2], sizes = [8, 1], strides = [1, 1]} : vector<8x4xf32> to vector<8x1xf32>
    %14 = vector.extract_strided_slice %1 {offsets = [2, 0], sizes = [1, 128], strides = [1, 1]} : vector<4x128xf32> to vector<1x128xf32>
    %15 = vector.broadcast %13 : vector<8x1xf32> to vector<8x128xf32>
    %16 = vector.broadcast %14 : vector<1x128xf32> to vector<8x128xf32>
    %17 = arith.mulf %15, %16 : vector<8x128xf32>
    %18 = arith.addf %12, %17 : vector<8x128xf32>
    %19 = vector.extract_strided_slice %0 {offsets = [0, 3], sizes = [8, 1], strides = [1, 1]} : vector<8x4xf32> to vector<8x1xf32>
    %20 = vector.extract_strided_slice %1 {offsets = [3, 0], sizes = [1, 128], strides = [1, 1]} : vector<4x128xf32> to vector<1x128xf32>
    %21 = vector.broadcast %19 : vector<8x1xf32> to vector<8x128xf32>
    %22 = vector.broadcast %20 : vector<1x128xf32> to vector<8x128xf32>
    %23 = arith.mulf %21, %22 : vector<8x128xf32>
    %24 = arith.addf %18, %23 : vector<8x128xf32>
    %c0_3 = arith.constant 0 : index
    %c0_4 = arith.constant 0 : index
    %25 = vector.load %arg2[%c0_3, %c0_4] : memref<1x128xf32, #tpu.memory_space<vmem>>, vector<1x128xf32>
    %26 = vector.broadcast %25 : vector<1x128xf32> to vector<8x128xf32>
    %27 = arith.addf %24, %26 : vector<8x128xf32>
    %28 = math.cos %27 : vector<8x128xf32>
    %cst = arith.constant 2.500000e-01 : f32
    %29 = vector.broadcast %cst : f32 to vector<8x128xf32>
    %30 = arith.mulf %29, %28 : vector<8x128xf32>
    %c0_5 = arith.constant 0 : index
    %c0_6 = arith.constant 0 : index
    %31 = vector.load %arg3[%c0_5, %c0_6] : memref<8x128xf32, #tpu.memory_space<vmem>>, vector<8x128xf32>
    tpu.vector_store %arg3[%c0_5, %c0_6], %30 {strides = array<i32>} : memref<8x128xf32, #tpu.memory_space<vmem>>, vector<8x128xf32>,
    return
  }
}

</mosaic_0001>

<bundles_post_ra>
// kernel: tpu_custom_call.1
= control target key start
LH: loop header
LB: loop body
LE: loop exit
PB: predicated region body
PF: predicated region fallthrough
CT: control target
= control target key end

     0   :  { %v235_v1 = vmov 0   ;;  %v236_v2 = vmov 2   ;;  %s299_s0 = inlined_call_operand.vmem [shape: f32[8,4], index: 0, kind: input, shape index: {}]   ;;  %s300_s1 = inlined_call_operand.vmem [shape: f32[4,128], index: 1, kind: input, shape index: {}]   ;;  %s301_s2 = inlined_call_operand.vmem [shape: f32[1,128], index: 2, kind: input, shape index: {}]   ;;  %s302_s3 = inlined_call_operand.hbm [shape: f32[8,128], index: 3, kind: output, shape index: {}]  }
   0x1   :  { %v15_v0 = vld [vmem:[%s299_s0] sm:$0xff]  ;;  %204 = vset.pattern.permute.xlu0 %v235_v1  ;;  %206 = vset.pattern.permute.xlu1 %v236_v2 }
   0x2   :  { %8 = vsyncpa [#allocation3], 0  ;;  %19 = vperm.xlu0 %204, %v15_v0   ;;  %38 = vperm.xlu1 %206, %v15_v0   ;;  %v237_v3 = vmov 1   ;;  %v238_v4 = vmov 3   ;;  %v22_v5 = vlaneseq  ;;  %v16_v9 = vld [vmem:[%s300_s1] sm:$0xf] }
   0x3   :  { %v184_v26 = vld [vmem:[%s301_s2] ss:$0 sm:$0xff]  ;;  %v239_v39 = vmov 683565275   ;;  %v240_v41 = vmov 2475754826  }
   0x4   :  { %v23_v6 = vshrl.u32 %v22_v5, 7  ;;  %v241_v44 = vmov 2131351028   ;;  %v242_v47 = vmov 2102212464   ;;  %s245_s1 = smov [#allocation2]  }
   0x5   :  { %v243_v50 = vmov 920167782   ;;  %v244_v53 = vmov 1326507024   ;;  %s176_s2 = sshll.u32 %s245_s1, 4  ;;  %s177_s2 = int_to_ptr.vmem [resolvable:$true] %s176_s2 }
   0x6   :  { %205 = vset.pattern.permute.xlu0 %v237_v3  ;;  %207 = vset.pattern.permute.xlu1 %v238_v4  ;;  %v24_v7 = vsub.s32 0, %v23_v6  ;;  %v33_v8 = vsub.s32 1, %v23_v6  ;;  %v43_v11 = vsub.s32 2, %v23_v6  ;;  %v53_v13 = vsub.s32 3, %v23_v6  ;;  %s213_s17 = scalar_lea.vmem %s177_s2, 128  ;;  %p218_p1 = scmp.lt.s32.totalorder %s177_s2, %s177_s2 }
   0x7   :  { %28 = vperm.xlu0 %205, %v15_v0   ;;  %48 = vperm.xlu1 %207, %v15_v0   ;;  %p214_p0 = scmp.ne.s32.totalorder %s177_s2, %s213_s17  ;;  %p219_p2 = scmp.lt.s32.totalorder %s213_s17, %s213_s17 }
   0x8   :  { %v25_v14 = vrot.slane %v16_v9, %v24_v7  ;;  %v34_v15 = vrot.slane %v16_v9, %v33_v8  ;;  %v44_v16 = vrot.slane %v16_v9, %v43_v11  ;;  %v54_v17 = vrot.slane %v16_v9, %v53_v13 }
   0x9   :  { %p220_p3 = por %p219_p2, %p218_p1 }
   0xb   :  { %208 = vset.pattern.permute.xlu0 %v238_v4  ;;  %p221_p4 = pnand %p220_p3, %p214_p0 }
  0x7d   :  { %v20_v10 = vpop.permute.xlu0 %19  ;;  %v39_v12 = vpop.permute.xlu1 %38 }
  0x7e   :  { %v26_v20 = vmul.f32 %v25_v14, %v20_v10  ;;  %v45_v22 = vmul.f32 %v44_v16, %v39_v12 }
  0x82   :  { %v29_v18 = vpop.permute.xlu0 %28  ;;  %v49_v19 = vpop.permute.xlu1 %48 }
  0x83   :  { %v35_v21 = vmul.f32 %v34_v15, %v29_v18  ;;  %v55_v24 = vmul.f32 %v54_v17, %v49_v19 }
  0x85   :  { %v36_v23 = vadd.f32 %v35_v21, %v26_v20 }
  0x87   :  { %v46_v25 = vadd.f32 %v45_v22, %v36_v23 }
  0x89   :  { %v56_v27 = vadd.f32 %v55_v24, %v46_v25 }
  0x8b   :  { %v275_v28 = vadd.f32 %v184_v26, %v56_v27 }
  0x8d   :  { %v68_v29 = vand.u32 2139095040, %v275_v28  ;;  %v65_v33 = vand.u32 2147483647, %v275_v28  ;;  %vm67_vm7 = vcmp.lt.s32.totalorder %v275_v28, 0  ;;  %vm157_vm12 = vweird.f32 %v275_v28 }
  0x8f   :  { %v69_v30 = vshrl.u32 %v68_v29, 23  ;;  %v72_v37 = vand.u32 8388607, %v65_v33  ;;  %vm66_vm8 = vcmp.le.f32.partialorder %v65_v33, 0.7853982 }
  0x91   :  { %v185_v31 = vadd.s32 4294967169, %v69_v30  ;;  %v73_v55 = vor.u32 8388608, %v72_v37 }
  0x93   :  { %v75_v32 = vadd.s32 1, %v185_v31  ;;  %v113_v5 = vshll.u32 %v73_v55, 8 }
  0x95   :  { %vm76_vm0 = vcmp.gt.s32.totalorder %v75_v32, 0 }
  0x96   :  { %v77_v34 = vsel %vm76_vm0, %v75_v32, 0 }
  0x97   :  { %v79_v35 = vand.u32 31, %v77_v34  ;;  %v78_v38 = vshrl.u32 %v77_v34, 5 }
  0x99   :  { %v80_v36 = vsub.s32 32, %v79_v35  ;;  %v82_v40 = vshll.u32 %v239_v39, %v79_v35  ;;  %v85_v42 = vshll.u32 %v240_v41, %v79_v35  ;;  %v88_v46 = vshll.u32 %v241_v44, %v79_v35 }
  0x9a   :  { %v91_v49 = vshll.u32 %v242_v47, %v79_v35  ;;  %v94_v52 = vshll.u32 %v243_v50, %v79_v35  ;;  %vm97_vm1 = vcmp.lt.s32.totalorder %v78_v38, 1  ;;  %vm100_vm2 = vcmp.lt.s32.totalorder %v78_v38, 4 }
  0x9b   :  { %v83_v43 = vshrl.u32 %v240_v41, %v80_v36  ;;  %v86_v45 = vshrl.u32 %v241_v44, %v80_v36  ;;  %v89_v48 = vshrl.u32 %v242_v47, %v80_v36  ;;  %v92_v51 = vshrl.u32 %v243_v50, %v80_v36 }
  0x9c   :  { %v95_v54 = vshrl.u32 %v244_v53, %v80_v36  ;;  %v81_v0 = vshrl.u32 %v239_v39, %v80_v36  ;;  %vm99_vm3 = vcmp.lt.s32.totalorder %v78_v38, 3  ;;  %vm98_vm4 = vcmp.lt.s32.totalorder %v78_v38, 2 }
  0x9d   :  { %v84_v56 = vor.u32 %v83_v43, %v82_v40  ;;  %v87_v57 = vor.u32 %v86_v45, %v85_v42  ;;  %v90_v58 = vor.u32 %v89_v48, %v88_v46  ;;  %v93_v59 = vor.u32 %v92_v51, %v91_v49 }
  0x9e   :  { %v96_v60 = vor.u32 %v95_v54, %v94_v52 }
  0x9f   :  { %v102_v61 = vsel %vm100_vm2, %v90_v58, 2102212464  ;;  %v105_v62 = vsel %vm97_vm1, %v84_v56, %v87_v57  ;;  %v109_v63 = vsel %vm97_vm1, %v87_v57, %v90_v58  ;;  %v106_v1 = vsel %vm100_vm2, %v93_v59, 920167782 }
  0xa0   :  { %v110_v2 = vsel %vm100_vm2, %v96_v60, 1326507024  ;;  %v107_v3 = vsel %vm99_vm3, %v90_v58, %v106_v1  ;;  %v101_v6 = vsel %vm97_vm1, %v81_v0, %v84_v56  ;;  %v103_v7 = vsel %vm99_vm3, %v87_v57, %v102_v61 }
  0xa1   :  { %v111_v4 = vsel %vm99_vm3, %v93_v59, %v110_v2  ;;  %v108_v8 = vsel %vm98_vm4, %v105_v62, %v107_v3  ;;  %v104_v14 = vsel %vm98_vm4, %v101_v6, %v103_v7 }
  0xa2   :  { %v112_v9 = vsel %vm98_vm4, %v109_v63, %v111_v4  ;;  %v284_v12 = vmul.u32.u64.low %v113_v5, %v108_v8  ;;  %v285_v13 = vmul.u32.u64.high %v113_v5, %v108_v8, %v284_v12  ;;  %v120_v16 = vmul.u32 %v113_v5, %v104_v14 }
  0xa3   :  { %v281_v10 = vmul.u32.u64.low %v113_v5, %v112_v9  ;;  %v282_v11 = vmul.u32.u64.high %v113_v5, %v112_v9, %v281_v10 }
  0xa4   :  { %v123_v15 = vadd.s32 1, %v285_v13 }
  0xa5   :  { %vm122_vm5 = vc.u32 %v282_v11, %v284_v12  ;;  %v121_v29 = vadd.s32 %v284_v12, %v282_v11 }
  0xa6   :  { %v124_v17 = vsel %vm122_vm5, %v123_v15, %v285_v13 }
  0xa7   :  { %v125_v18 = vadd.s32 %v124_v17, %v120_v16 }
  0xa9   :  { %v126_v19 = vadd.s32 536870912, %v125_v18 }
  0xab   :  { %v127_v20 = vshrl.u32 %v126_v19, 30 }
  0xad   :  { %v128_v21 = vshll.u32 %v127_v20, 30  ;;  %v151_v45 = vsub.s32 4, %v127_v20 }
  0xaf   :  { %v129_v22 = vsub.s32 %v125_v18, %v128_v21  ;;  %v152_v46 = vsel %vm67_vm7, %v151_v45, %v127_v20 }
  0xb0   :  { %v154_v47 = vsel %vm66_vm8, 0, %v152_v46 }
  0xb1   :  { %v131_v23 = vsub.s32 0, %v129_v22  ;;  %v158_v48 = vand.u32 3, %v154_v47 }
  0xb3   :  { %v186_v24 = vmin.u32 %v131_v23, %v129_v22  ;;  %vm163_vm9 = vcmp.eq.s32.totalorder %v158_v48, 2  ;;  %vm160_vm10 = vcmp.eq.s32.totalorder %v158_v48, 0  ;;  %vm159_vm11 = vcmp.lt.s32.totalorder %v158_v48, 2 }
  0xb5   :  { %v133_v25 = vclz %v186_v24 }
  0xb7   :  { %v187_v26 = vadd.s32 4294967294, %v133_v25 }
  0xb9   :  { %vm188_vm6 = vcmp.lt.s32.totalorder %v187_v26, 0 }
  0xba   :  { %v136_v27 = vsel %vm188_vm6, 0, %v187_v26 }
  0xbb   :  { %v137_v30 = vsub.s32 32, %v136_v27  ;;  %v141_v31 = vsub.s32 4294967266, %v136_v27  ;;  %v138_v32 = vshll.u32 %v129_v22, %v136_v27 }
  0xbd   :  { %v139_v34 = vshrl.u32 %v121_v29, %v137_v30  ;;  %v142_v35 = vadd.s32 127, %v141_v31 }
  0xbf   :  { %v140_v36 = vor.u32 %v139_v34, %v138_v32  ;;  %v143_v37 = vshll.u32 %v142_v35, 23 }
  0xc1   :  { %v144_v38 = vor.u32 4788187, %v143_v37  ;;  %v147_v40 = vcvt.s32.f32 %v140_v36 }
  0xc3   :  { %v145_v39 = vand.u32 2147483647, %v144_v38 }
  0xc5   :  { %v148_v41 = vmul.f32 %v147_v40, %v145_v39 }
  0xc7   :  { %v149_v42 = vxor.u32 2147483648, %v148_v41 }
  0xc9   :  { %v150_v43 = vsel %vm67_vm7, %v149_v42, %v148_v41 }
  0xca   :  { %v153_v44 = vsel %vm66_vm8, %v275_v28, %v150_v43 }
  0xcb   :  { %209 = vcosq.f32 %v153_v44 }
  0xcc   :  { %211 = vsinq.f32 %v153_v44 }
  0xd8   :  { %v210_v49 = vpop.eup %209 }
  0xd9   :  { %v212_v50 = vpop.eup %211  ;;  %v164_v51 = vxor.u32 2147483648, %v210_v49 }
  0xda   :  { %v161_v52 = vxor.u32 2147483648, %v212_v50 }
  0xdb   :  { %v165_v53 = vsel %vm163_vm9, %v164_v51, %v212_v50 }
  0xdc   :  { %v162_v54 = vsel %vm160_vm10, %v210_v49, %v161_v52 }
  0xdd   :  { %v166_v33 = vsel %vm159_vm11, %v162_v54, %v165_v53 }
  0xde   :  { %v167_v55 = vsel %vm157_vm12, nan, %v166_v33 }
  0xdf   :  { %v168_v56 = vmul.f32 0.25, %v167_v55 }
  0xe1   :  { %169 = vst [vmem:[#allocation2] sm:$0xff] %v168_v56 }
  0xe2   :  { %224 = shalt.err (!%p221_p4)
}
  0xe3   :  { %179 = dma.vmem_to_hbm [thread:$0]  %s177_s2, 128, %s302_s3, [#allocation3]  }
  0xe4   :  { %233 = dma.done.wait [#allocation3], 128  }
  0xe5   :  { %234 = vsyncadd [#allocation3], 4294967168 }
  0xe6   :  { %183 = vsyncpa [#allocation3], 1 }

</bundles_post_ra>
